<compile_context>
chip_gen: v5e
topology: v5e:2x2
jax: 0.10.0
libtpu: 0.0.40
codegen_flags: <defaults>
</compile_context>

<pallas_src>
import jax
import jax.numpy as jnp
from jax import lax
from jax.experimental import pallas as pl
from jax.experimental.pallas import tpu as pltpu

GAMMA = 2.0
ALPHA = 0.25


def _round_up(x, m):
    return (x + m - 1) // m * m


def _make_kernel(compact_w: bool, num_classes: int, padded_classes: int,
                 anchors_per_row: int):
    C, Cp, G = num_classes, padded_classes, anchors_per_row

    def kernel(x_ref, t_ref, w_ref, o_ref, acc_ref):
        step = pl.program_id(1)

        @pl.when(step == 0)
        def _init():
            acc_ref[...] = jnp.zeros_like(acc_ref)

        x = x_ref[...].astype(jnp.float32)   # (tile, 128) logits
        t = t_ref[...].astype(jnp.float32)   # (tile, 128) one-hot targets

        if compact_w:
            # Expand per-anchor weights (tile, G) -> per-element (tile, 128)
            # with a tiny 0/1 matrix on the otherwise-idle MXU. Padded class
            # lanes (>= C within each Cp-wide group) get weight 0.
            wc = w_ref[...]                                          # (tile, G)
            g_idx = lax.broadcasted_iota(jnp.int32, (G, 128), 0)
            l_idx = lax.broadcasted_iota(jnp.int32, (G, 128), 1)
            lo = g_idx * Cp
            expand = ((l_idx >= lo) & (l_idx < lo + C)).astype(jnp.float32)
            w = jnp.dot(wc, expand, preferred_element_type=jnp.float32)
        else:
            w = w_ref[...]                                           # (tile, 128)

        # sigmoid via tanh identity: one EUP op, no |x| / select / reciprocal.
        sig = 0.5 * jnp.tanh(0.5 * x) + 0.5
        one_m_sig = 1.0 - sig

        alpha_w = (1.0 - ALPHA) + t * (2.0 * ALPHA - 1.0)
        pt = sig + t * (one_m_sig - sig)          # t*(1-sig) + (1-t)*sig
        if GAMMA == 2.0:
            focal_w = alpha_w * (pt * pt)         # gamma == 2 -> no pow
        else:
            focal_w = alpha_w * (pt ** GAMMA)

        # max(x, 0) - x*t + log1p(exp(-|x|)); log1p term == -log(max(sig,1-sig)).
        bce = jnp.maximum(x, 0.0) - x * t - jnp.log(jnp.maximum(sig, one_m_sig))

        loss = focal_w * bce * w                                   # (tile, 128)
        # Layout-preserving reshape: (tile,128) -> (tile//8, 8, 128); sum over
        # the leading axis is pure vreg adds (no XLU), folded into (8,128) acc.
        acc_ref[...] += jnp.sum(loss.reshape(-1, 8, 128), axis=0)

        @pl.when(step == pl.num_programs(1) - 1)
        def _finalize():
            o_ref[...] = acc_ref[...].reshape(o_ref.shape)

    return kernel


def sigmoid_focal_classification_loss(logits, targets, weights, *,
                                      tile_rows=4096, n_splits=2):
    """logits/targets: (B, A, C); weights: (B, A). Returns scalar f32 loss sum."""
    B, A, C = logits.shape
    N = B * A

    def to_kernel_dtype(a):
        # Keep bf16 inputs as bf16 (half the HBM bytes); cast in-kernel.
        return a if a.dtype in (jnp.bfloat16, jnp.float32) else a.astype(jnp.float32)

    x = to_kernel_dtype(logits).reshape(N, C)
    t = to_kernel_dtype(targets).reshape(N, C)
    w = weights.astype(jnp.float32).reshape(N)

    compact_w = C <= 128
    if compact_w:
        # Smallest power-of-two (divisor of 128) >= C.
        Cp = 1
        while Cp < C:
            Cp *= 2
        G = 128 // Cp
        if Cp != C:
            x = jnp.pad(x, ((0, 0), (0, Cp - C)))
            t = jnp.pad(t, ((0, 0), (0, Cp - C)))
        rows = pl.cdiv(N, G)
    else:
        Cp = C
        G = 0
        rows = pl.cdiv(N * C, 128)

    rows_per_split = pl.cdiv(rows, n_splits)
    tile = min(_round_up(tile_rows, 16), _round_up(rows_per_split, 16))
    steps = pl.cdiv(rows_per_split, tile)
    total_rows = n_splits * steps * tile

    if compact_w:
        pad_anchors = total_rows * G - N
        if pad_anchors:
            x = jnp.pad(x, ((0, pad_anchors), (0, 0)))
            t = jnp.pad(t, ((0, pad_anchors), (0, 0)))
            w = jnp.pad(w, (0, pad_anchors))       # zero weight -> zero loss
        x2 = x.reshape(total_rows, 128)
        t2 = t.reshape(total_rows, 128)
        w2 = w.reshape(total_rows, G)
        w_block = (tile, G)
    else:
        # Rare fallback for C > 128: per-element weights, flat 128-lane rows.
        xf = x.reshape(-1)
        tf = t.reshape(-1)
        wf = jnp.broadcast_to(w[:, None], (N, C)).reshape(-1)
        pad = total_rows * 128 - N * C
        if pad:
            xf = jnp.pad(xf, (0, pad))
            tf = jnp.pad(tf, (0, pad))
            wf = jnp.pad(wf, (0, pad))
        x2 = xf.reshape(total_rows, 128)
        t2 = tf.reshape(total_rows, 128)
        w2 = wf.reshape(total_rows, 128)
        w_block = (tile, 128)

    kernel = _make_kernel(compact_w, C, Cp, G)

    out = pl.pallas_call(
        kernel,
        out_shape=jax.ShapeDtypeStruct((n_splits, 8, 128), jnp.float32),
        grid_spec=pltpu.PrefetchScalarGridSpec(
            num_scalar_prefetch=0,
            grid=(n_splits, steps),
            in_specs=[
                pl.BlockSpec((tile, 128), lambda c, i: (c * steps + i, 0)),
                pl.BlockSpec((tile, 128), lambda c, i: (c * steps + i, 0)),
                pl.BlockSpec(w_block, lambda c, i: (c * steps + i, 0)),
            ],
            out_specs=pl.BlockSpec((1, 8, 128), lambda c, i: (c, 0, 0)),
            scratch_shapes=[pltpu.VMEM((8, 128), jnp.float32)],
        ),
        compiler_params=pltpu.CompilerParams(
            dimension_semantics=("parallel", "arbitrary"),
        ),
    )(x2, t2, w2)

    # Each split left its per-position partial sums in its (8, 128) block.
    return jnp.sum(out)


def _reference(logits, targets, weights):
    x = logits.astype(jnp.float32)
    t = targets.astype(jnp.float32)
    p = jax.nn.sigmoid(x)
    alpha_w = t * ALPHA + (1.0 - t) * (1.0 - ALPHA)
    pt = t * (1.0 - p) + (1.0 - t) * p
    focal_w = alpha_w * jnp.power(pt, GAMMA)
    bce = (jnp.maximum(x, 0.0) - x * t + jnp.log1p(jnp.exp(-jnp.abs(x))))
    return jnp.sum(focal_w * bce * weights[..., None].astype(jnp.float32))


if __name__ == "__main__":
    key = jax.random.PRNGKey(0)
    k1, k2, k3 = jax.random.split(key, 3)

    B, A, C = 2, 128, 8        # batch, anchors, classes
    logits = jax.random.normal(k1, (B, A, C), dtype=jnp.float32) * 2.0
    cls_idx = jax.random.randint(k2, (B, A), 0, C)
    targets = jax.nn.one_hot(cls_idx, C, dtype=jnp.float32)
    weights = jax.random.uniform(k3, (B, A), dtype=jnp.float32)

    loss_fn = jax.jit(sigmoid_focal_classification_loss)
    out = jax.block_until_ready(loss_fn(logits, targets, weights))
    ref = jax.block_until_ready(_reference(logits, targets, weights))

    assert jnp.allclose(out, ref, rtol=1e-4, atol=1e-4), (out, ref)
    print("KERNEL_OK")
</pallas_src>

<mosaic_0001>
module attributes {stable_mosaic.version = 11 : i64} {
  func.func @kernel(%arg0: i32, %arg1: i32, %arg2: memref<16x128xf32, #tpu.memory_space<vmem>>, %arg3: memref<16x128xf32, #tpu.memory_space<vmem>>, %arg4: memref<16x16xf32, #tpu.memory_space<vmem>>, %arg5: memref<1x8x128xf32, #tpu.memory_space<vmem>>, %arg6: memref<8x128xf32, #tpu.memory_space<vmem>>) attributes {dimension_semantics = [#tpu.dimension_semantics<parallel>, #tpu.dimension_semantics<arbitrary>], iteration_bounds = array<i64: 2, 1>, scalar_prefetch = 0 : i64, scratch_operands = 1 : i64, tpu.core_type = #tpu.core_type<tc>, window_params = [{transform_indices = @transform_0, window_bounds = array<i64: 16, 128>}, {transform_indices = @transform_1, window_bounds = array<i64: 16, 128>}, {transform_indices = @transform_2, window_bounds = array<i64: 16, 16>}, {transform_indices = @transform_3, window_bounds = array<i64: 1, 8, 128>}]} {
    %c0_i32 = arith.constant 0 : i32
    %0 = arith.cmpi eq, %arg1, %c0_i32 : i32
    %1 = arith.extui %0 : i1 to i32
    %c0_i32_0 = arith.constant 0 : i32
    %2 = arith.cmpi ne, %1, %c0_i32_0 : i32
    scf.if %2 {
      %cst_21 = arith.constant 0.000000e+00 : f32
      %53 = vector.broadcast %cst_21 : f32 to vector<8x128xf32>
      %c0_22 = arith.constant 0 : index
      %c0_23 = arith.constant 0 : index
      %54 = vector.load %arg6[%c0_22, %c0_23] : memref<8x128xf32, #tpu.memory_space<vmem>>, vector<8x128xf32>
      tpu.vector_store %arg6[%c0_22, %c0_23], %53 {strides = array<i32>} : memref<8x128xf32, #tpu.memory_space<vmem>>, vector<8x128xf32>,
    } else {
    }
    %c0 = arith.constant 0 : index
    %c0_1 = arith.constant 0 : index
    %3 = vector.load %arg2[%c0, %c0_1] : memref<16x128xf32, #tpu.memory_space<vmem>>, vector<16x128xf32>
    %c0_2 = arith.constant 0 : index
    %c0_3 = arith.constant 0 : index
    %4 = vector.load %arg3[%c0_2, %c0_3] : memref<16x128xf32, #tpu.memory_space<vmem>>, vector<16x128xf32>
    %c0_4 = arith.constant 0 : index
    %c0_5 = arith.constant 0 : index
    %5 = vector.load %arg4[%c0_4, %c0_5] : memref<16x16xf32, #tpu.memory_space<vmem>>, vector<16x16xf32>
    %6 = tpu.iota {dimensions = array<i32: 0>} : vector<16x128xi32>
    %7 = tpu.iota {dimensions = array<i32: 1>} : vector<16x128xi32>
    %c8_i32 = arith.constant 8 : i32
    %8 = vector.broadcast %c8_i32 : i32 to vector<16x128xi32>
    %9 = arith.muli %6, %8 : vector<16x128xi32>
    %10 = arith.cmpi sge, %7, %9 : vector<16x128xi32>
    %c8_i32_6 = arith.constant 8 : i32
    %11 = vector.broadcast %c8_i32_6 : i32 to vector<16x128xi32>
    %12 = arith.addi %9, %11 : vector<16x128xi32>
    %13 = arith.cmpi slt, %7, %12 : vector<16x128xi32>
    %14 = arith.andi %10, %13 : vector<16x128xi1>
    %15 = arith.extui %14 : vector<16x128xi1> to vector<16x128xi32>
    %16 = arith.sitofp %15 : vector<16x128xi32> to vector<16x128xf32>
    %cst = arith.constant dense<0.000000e+00> : vector<16x128xf32>
    %17 = tpu.matmul %5, %16, %cst {dimension_numbers = #tpu.dot_dimension_numbers<[1], [0], [0], [1], [0, 0, 1, 1], [], []>} : vector<16x16xf32>, vector<16x128xf32>, vector<16x128xf32> -> vector<16x128xf32>
    %cst_7 = arith.constant 5.000000e-01 : f32
    %18 = vector.broadcast %cst_7 : f32 to vector<16x128xf32>
    %19 = arith.mulf %18, %3 : vector<16x128xf32>
    %20 = math.tanh %19 : vector<16x128xf32>
    %cst_8 = arith.constant 5.000000e-01 : f32
    %21 = vector.broadcast %cst_8 : f32 to vector<16x128xf32>
    %22 = arith.mulf %21, %20 : vector<16x128xf32>
    %cst_9 = arith.constant 5.000000e-01 : f32
    %23 = vector.broadcast %cst_9 : f32 to vector<16x128xf32>
    %24 = arith.addf %22, %23 : vector<16x128xf32>
    %cst_10 = arith.constant 1.000000e+00 : f32
    %25 = vector.broadcast %cst_10 : f32 to vector<16x128xf32>
    %26 = arith.subf %25, %24 : vector<16x128xf32>
    %cst_11 = arith.constant -5.000000e-01 : f32
    %27 = vector.broadcast %cst_11 : f32 to vector<16x128xf32>
    %28 = arith.mulf %4, %27 : vector<16x128xf32>
    %cst_12 = arith.constant 7.500000e-01 : f32
    %29 = vector.broadcast %cst_12 : f32 to vector<16x128xf32>
    %30 = arith.addf %29, %28 : vector<16x128xf32>
    %31 = arith.subf %26, %24 : vector<16x128xf32>
    %32 = arith.mulf %4, %31 : vector<16x128xf32>
    %33 = arith.addf %24, %32 : vector<16x128xf32>
    %34 = arith.mulf %33, %33 : vector<16x128xf32>
    %35 = arith.mulf %30, %34 : vector<16x128xf32>
    %cst_13 = arith.constant 0.000000e+00 : f32
    %36 = vector.broadcast %cst_13 : f32 to vector<16x128xf32>
    %37 = arith.maximumf %3, %36 : vector<16x128xf32>
    %38 = arith.mulf %3, %4 : vector<16x128xf32>
    %39 = arith.subf %37, %38 : vector<16x128xf32>
    %40 = arith.maximumf %24, %26 : vector<16x128xf32>
    %41 = math.log %40 : vector<16x128xf32>
    %42 = arith.subf %39, %41 : vector<16x128xf32>
    %43 = arith.mulf %35, %42 : vector<16x128xf32>
    %44 = arith.mulf %43, %17 : vector<16x128xf32>
    %c0_14 = arith.constant 0 : index
    %c0_15 = arith.constant 0 : index
    %45 = vector.load %arg6[%c0_14, %c0_15] : memref<8x128xf32, #tpu.memory_space<vmem>>, vector<8x128xf32>
    %46 = vector.shape_cast %44 : vector<16x128xf32> to vector<2x8x128xf32>
    %cst_16 = arith.constant dense<0.000000e+00> : vector<8x128xf32>
    %47 = vector.multi_reduction <add>, %46, %cst_16 [0] : vector<2x8x128xf32> to vector<8x128xf32>
    %48 = arith.addf %45, %47 : vector<8x128xf32>
    %c0_17 = arith.constant 0 : index
    %c0_18 = arith.constant 0 : index
    %49 = vector.load %arg6[%c0_17, %c0_18] : memref<8x128xf32, #tpu.memory_space<vmem>>, vector<8x128xf32>
    tpu.vector_store %arg6[%c0_17, %c0_18], %48 {strides = array<i32>} : memref<8x128xf32, #tpu.memory_space<vmem>>, vector<8x128xf32>,
    %c0_i32_19 = arith.constant 0 : i32
    %50 = arith.cmpi eq, %arg1, %c0_i32_19 : i32
    %51 = arith.extui %50 : i1 to i32
    %c0_i32_20 = arith.constant 0 : i32
    %52 = arith.cmpi ne, %51, %c0_i32_20 : i32
    scf.if %52 {
      %c0_21 = arith.constant 0 : index
      %c0_22 = arith.constant 0 : index
      %53 = vector.load %arg6[%c0_21, %c0_22] : memref<8x128xf32, #tpu.memory_space<vmem>>, vector<8x128xf32>
      %54 = vector.shape_cast %53 : vector<8x128xf32> to vector<1x8x128xf32>
      %c0_23 = arith.constant 0 : index
      %c0_24 = arith.constant 0 : index
      %c0_25 = arith.constant 0 : index
      %55 = vector.load %arg5[%c0_23, %c0_24, %c0_25] : memref<1x8x128xf32, #tpu.memory_space<vmem>>, vector<1x8x128xf32>
      tpu.vector_store %arg5[%c0_23, %c0_24, %c0_25], %54 {strides = array<i32>} : memref<1x8x128xf32, #tpu.memory_space<vmem>>, vector<1x8x128xf32>,
    } else {
    }
    return
  }
  func.func @transform_0(%arg0: i32, %arg1: i32) -> (i32, i32) {
    %c1_i32 = arith.constant 1 : i32
    %0 = arith.muli %arg0, %c1_i32 : i32
    %1 = arith.addi %0, %arg1 : i32
    %c0_i32 = arith.constant 0 : i32
    %c0_i32_0 = arith.constant 0 : i32
    return %1, %c0_i32 : i32, i32
  }
  func.func @transform_1(%arg0: i32, %arg1: i32) -> (i32, i32) {
    %c1_i32 = arith.constant 1 : i32
    %0 = arith.muli %arg0, %c1_i32 : i32
    %1 = arith.addi %0, %arg1 : i32
    %c0_i32 = arith.constant 0 : i32
    %c0_i32_0 = arith.constant 0 : i32
    return %1, %c0_i32 : i32, i32
  }
  func.func @transform_2(%arg0: i32, %arg1: i32) -> (i32, i32) {
    %c1_i32 = arith.constant 1 : i32
    %0 = arith.muli %arg0, %c1_i32 : i32
    %1 = arith.addi %0, %arg1 : i32
    %c0_i32 = arith.constant 0 : i32
    %c0_i32_0 = arith.constant 0 : i32
    return %1, %c0_i32 : i32, i32
  }
  func.func @transform_3(%arg0: i32, %arg1: i32) -> (i32, i32, i32) {
    %c0_i32 = arith.constant 0 : i32
    %c0_i32_0 = arith.constant 0 : i32
    %c0_i32_1 = arith.constant 0 : i32
    return %arg0, %c0_i32, %c0_i32_0 : i32, i32, i32
  }
}

</mosaic_0001>

<bundles_post_ra>
// kernel: sigmoid_focal_classification_loss.1
= control target key start
LH: loop header
LB: loop body
LE: loop exit
PB: predicated region body
PF: predicated region fallthrough
CT: control target
= control target key end

     0   :  { %s544_s12 = smov 0   ;;  %s546_s13 = smov 0   ;;  %s593_s0 = inlined_call_operand.vmem [shape: f32[32,128], index: 0, kind: input, shape index: {}]   ;;  %s594_s1 = inlined_call_operand.vmem [shape: f32[32,128], index: 1, kind: input, shape index: {}]   ;;  %s595_s2 = inlined_call_operand.vmem [shape: f32[32,16], index: 2, kind: input, shape index: {}]   ;;  %s596_s3 = inlined_call_operand.vmem [shape: f32[2,8,128], index: 3, kind: output, shape index: {}]  }
   0x1   :  { %s548_s14 = smov 0  }
   0x2 LB: > { %s25_s15 = sadd.s32 1, %s517_s13  ;;  %p448_p0 = scmp.ge.s32.totalorder %s521_s14, 1  ;;  %s521_s14 = sphi %s548_s14, %s13_s14   ;;  %s517_s13 = sphi %s546_s13, %s598_s13   ;;  %s513_s12 = sphi %s544_s12, %s597_s12  }
   0x3   : > { %p27_p1 = scmp.ge.s32.totalorder %s25_s15, 2  ;;  %p184_p2 = scmp.lt.s32.totalorder %s521_s14, 3 }
   0x5   : > { %s600_s15 = smov (%p27_p1, %s25_s15), 0  ;;  %p185_p3 = pnand %p448_p0, %p184_p2 }
   0x6   : > { %s449_s16 = sshll.u32 (!%p185_p3), %s513_s12, 1  ;;  %p244_p5 = scmp.lt.s32.totalorder (!%p185_p3), %s513_s12, 1 }
   0x7   : > { %188 = sbr.rel (%p185_p3) target bundleno = 158 (0x9e), region = 32  ;;  %p222_p4 = scmp.lt.s32.totalorder (!%p185_p3), %s449_s16, 3 }
   0xc   : > { %v259_v0 = vlaneseq  ;;  %s602_s16 = smov (!%p222_p4, %s449_s16), 3  ;;  %v523_v8 = vmov 1.0   ;;  %vm278_vm6 = vcmask 130048   ;;  %s604_s12 = smov (!%p244_p5, %s513_s12), 1 }
   0xd   : > { %s565_s17 = sshll.u32 %s602_s16, 3  ;;  %s455_s27 = sshll.u32 %s604_s12, 3 }
   0xe   : > { %v260_v1 = vshrl.u32 %v259_v0, 7  ;;  %v263_v3 = vand.u32 127, %v259_v0  ;;  %s241_s20 = scalar_lea.vmem %s595_s2, %s565_s17  ;;  %s225_s23 = scalar_lea.vmem %s593_s0, %s565_s17 }
   0xf   : > { %v257_v9 = vld [vmem:[%s241_s20] sm:$0xff]  ;;  %v258_v10 = vld [vmem:[%s241_s20 + $0x8] sm:$0xff]  ;;  %s233_s26 = scalar_lea.vmem %s594_s1, %s565_s17  ;;  %s247_s30 = scalar_lea.vmem %s596_s3, %s455_s27 }
  0x10   : > { %v261_v2 = vadd.s32 8, %v260_v1  ;;  %v264_v4 = vmul.u32 8, %v260_v1  ;;  %v253_v11 = vld [vmem:[%s225_s23] sm:$0xff]  ;;  %v254_v12 = vld [vmem:[%s225_s23 + $0x8] sm:$0xff] }
  0x11   : > { %v308_v13 = vmul.f32 0.5, %v253_v11  ;;  %v309_v14 = vmul.f32 0.5, %v254_v12  ;;  %v255_v26 = vld [vmem:[%s233_s26] sm:$0xff]  ;;  %v256_v28 = vld [vmem:[%s233_s26 + $0x8] sm:$0xff]  ;;  %v332_v33 = vmax.f32 %v253_v11, 0.0  ;;  %v333_v38 = vmax.f32 %v254_v12, 0.0 }
  0x12   : > { %v265_v5 = vmul.u32 8, %v261_v2  ;;  %v268_v6 = vadd.s32 8, %v264_v4  ;;  %vm266_vm0 = vcmp.ge.s32.totalorder %v263_v3, %v264_v4  ;;  %v318_v31 = vmul.f32 -0.5, %v255_v26 }
  0x13   : > { %491 = vtanh.f32 %v308_v13  ;;  %v334_v34 = vmul.f32 %v255_v26, %v253_v11  ;;  %v319_v36 = vmul.f32 -0.5, %v256_v28  ;;  %v335_v39 = vmul.f32 %v256_v28, %v254_v12 }
  0x14   : > { %vm267_vm1 = vcmp.ge.s32.totalorder %v263_v3, %v265_v5  ;;  %v269_v7 = vadd.s32 8, %v265_v5  ;;  %vm270_vm2 = vcmp.lt.s32.totalorder %v263_v3, %v268_v6  ;;  %493 = vtanh.f32 %v309_v14 }
  0x15   : > { %vm272_vm4 = vmand %vm266_vm0, %vm270_vm2  ;;  %v320_v41 = vadd.f32 0.75, %v318_v31  ;;  %v336_v43 = vsub.f32 %v332_v33, %v334_v34  ;;  %v321_v45 = vadd.f32 0.75, %v319_v36  ;;  %v337_v47 = vsub.f32 %v333_v38, %v335_v39 }
  0x16   : > { %vm271_vm3 = vcmp.lt.s32.totalorder %v263_v3, %v269_v7 }
  0x17   : > { %vm273_vm5 = vmand %vm267_vm1, %vm271_vm3 }
  0x18   : > { %458 = vmatpush.msk.msra.mxu0 %vm273_vm5, %v523_v8  ;;  %464 = vmatpush.msk.msra.mxu1 %vm273_vm5, %v523_v8 }
  0x19   : > { %v492_v15 = vpop.eup %491 }
  0x1a   : > { %459 = vmatpush.msk.msra.mxu0 %vm272_vm4, %v523_v8  ;;  %465 = vmatpush.msk.msra.mxu1 %vm272_vm4, %v523_v8  ;;  %v494_v16 = vpop.eup %493  ;;  %v312_v17 = vmul.f32 0.5, %v492_v15 }
  0x1b   : > { %460 = vmatmul.msk.f32.vlgmr.msra.gmra.mxu0 %vm278_vm6, %v257_v9  ;;  %461 = vmatmul.msk.f32.vlgmr.msra.gmra.mxu1 %vm278_vm6, %v258_v10  ;;  %v313_v18 = vmul.f32 0.5, %v494_v16 }
  0x1c   : > { %v314_v19 = vadd.f32 0.5, %v312_v17 }
  0x1d   : > { %v315_v20 = vadd.f32 0.5, %v313_v18 }
  0x1e   : > { %v316_v21 = vsub.f32 1.0, %v314_v19 }
  0x1f   : > { %v317_v22 = vsub.f32 1.0, %v315_v20 }
  0x20   : > { %v338_v23 = vmax.f32 %v314_v19, %v316_v21  ;;  %v322_v24 = vsub.f32 %v316_v21, %v314_v19 }
  0x21   : > { %v339_v25 = vmax.f32 %v315_v20, %v317_v22  ;;  %v323_v27 = vsub.f32 %v317_v22, %v315_v20 }
  0x22   : > { %495 = vlog2.f32 %v338_v23  ;;  %v324_v29 = vmul.f32 %v322_v24, %v255_v26 }
  0x23   : > { %497 = vlog2.f32 %v339_v25  ;;  %v325_v30 = vmul.f32 %v323_v27, %v256_v28 }
  0x24   : > { %v326_v32 = vadd.f32 %v324_v29, %v314_v19 }
  0x25   : > { %v327_v37 = vadd.f32 %v325_v30, %v315_v20 }
  0x26   : > { %v328_v42 = vmul.f32 %v326_v32, %v326_v32 }
  0x27   : > { %v329_v46 = vmul.f32 %v327_v37, %v327_v37 }
  0x28   : > { %v496_v35 = vpop.eup %495  ;;  %v330_v49 = vmul.f32 %v328_v42, %v320_v41 }
  0x29   : > { %v498_v40 = vpop.eup %497  ;;  %v341_v44 = vmul.f32 0.6931472, %v496_v35  ;;  %v331_v51 = vmul.f32 %v329_v46, %v321_v45 }
  0x2a   : > { %v343_v48 = vmul.f32 0.6931472, %v498_v40 }
  0x2b   : > { %v344_v50 = vsub.f32 %v336_v43, %v341_v44 }
  0x2c   : > { %v345_v52 = vsub.f32 %v337_v47, %v343_v48 }
  0x2d   : > { %v346_v53 = vmul.f32 %v344_v50, %v330_v49 }
  0x2e   : > { %v347_v54 = vmul.f32 %v345_v52, %v331_v51 }
  0x98   : > { %v302_v55 = vpop.f32.mrf.mxu0  ;;  %v305_v56 = vpop.f32.mrf.mxu1 }
  0x99   : > { %v348_v57 = vmul.f32 %v346_v53, %v302_v55  ;;  %v349_v58 = vmul.f32 %v347_v54, %v305_v56 }
  0x9b   : > { %v351_v59 = vadd.f32 %v349_v58, %v348_v57 }
  0x9d   : > { %358 = vst [vmem:[%s247_s30] sm:$0xff] %v351_v59 }
  0x9e PF: > { %s13_s14 = sadd.s32 1, %s521_s14   ;;  %s597_s12 = smov %s517_s13 }
  0x9f   : > { %p10_p6 = scmp.ge.s32.totalorder %s13_s14, 4   ;;  %s598_s13 = smov %s600_s15 }
  0xa1   :  { %12 = sbr.rel (!%p10_p6) target bundleno = 2 (0x2), region = 76 }

</bundles_post_ra>
